<compile_context>
chip_gen: v7x
topology: tpu7x:2x2x1
jax: 0.10.0
libtpu: 0.0.40
codegen_flags: <defaults>
</compile_context>

<pallas_src>
import functools

import jax
import jax.numpy as jnp
from jax import lax
from jax.experimental import pallas as pl
from jax.experimental.pallas import tpu as pltpu

_LANE = 128


def _hash_uniform(lin_idx_u32, seed_u32):
    """Stateless uniform [0,1) from a uint32 counter (murmur3-style finalizer)."""
    z = lin_idx_u32 + seed_u32 * jnp.uint32(0x9E3779B9)
    z = z ^ (z >> jnp.uint32(16))
    z = z * jnp.uint32(0x7FEB352D)
    z = z ^ (z >> jnp.uint32(15))
    z = z * jnp.uint32(0x846CA68B)
    z = z ^ (z >> jnp.uint32(16))
    # 24 random bits -> exact float in [0, 1).
    r = (z >> jnp.uint32(8)).astype(jnp.int32).astype(jnp.float32)
    return r * jnp.float32(1.0 / (1 << 24))


def _group_max(xp, normalization_type):
    if normalization_type == "TemporalMax":          # max over batch (torch dim=0)
        return jnp.max(xp, axis=0, keepdims=True)
    elif normalization_type == "SpatialMax":         # max over channels (torch dim=1)
        return jnp.max(xp, axis=1, keepdims=True)
    elif normalization_type == "SpatiotemporalMax":
        return jnp.max(jnp.max(xp, axis=0, keepdims=True), axis=1, keepdims=True)
    raise NotImplementedError("normalization type not implemented")


def _normout_kernel(seed_ref, x_ref, o_ref, *, normalization_type, use_abs, hw_total):
    i = pl.program_id(0)                  # tile index along flattened H*W
    x = x_ref[...]                        # (B, C, T)
    B, C, T = x.shape

    xf = x.astype(jnp.float32)            # math in f32 (also covers bf16 inputs)
    xp = jnp.abs(xf) if use_abs else xf

    m = _group_max(xp, normalization_type)        # (1,C,T) / (B,1,T) / (1,1,T)
    norm_x = xp * (1.0 / m)               # divide only the reduced tensor

    # Global element index (row-major over the (B, C, H*W) view) -> hash -> u.
    b_idx = lax.broadcasted_iota(jnp.int32, x.shape, 0).astype(jnp.uint32)
    c_idx = lax.broadcasted_iota(jnp.int32, x.shape, 1).astype(jnp.uint32)
    w_idx = lax.broadcasted_iota(jnp.int32, x.shape, 2).astype(jnp.uint32)
    col = w_idx + jnp.uint32(T) * lax.convert_element_type(i, jnp.uint32)
    lin = (b_idx * jnp.uint32(C) + c_idx) * jnp.uint32(hw_total) + col
    u = _hash_uniform(lin, seed_ref[0].astype(jnp.uint32))

    # keep iff u < norm_x ; single select (no bool->f32 convert + multiply).
    o_ref[...] = jnp.where(u < norm_x, x, jnp.zeros_like(x))


def _pick_tile_cols(hw, bytes_per_col, max_tile_cols=None):
    """Multiple of 128 (or full hw if hw<128) keeping one block near ~2 MiB."""
    if hw <= _LANE:
        t = hw                                    # full extent: always legal
    else:
        target_block_bytes = 2 << 20
        t = (target_block_bytes // max(bytes_per_col, 1)) // _LANE * _LANE
        t = max(_LANE, min(t, (hw // _LANE) * _LANE))
    if max_tile_cols is not None:
        t = max(1, min(t, max_tile_cols))
    return int(t)


def normout(x, seed, normalization_type="SpatialMax", use_abs=True, training=True,
            max_tile_cols=None):
    """NormOut forward. x is NCHW. Returns same shape/dtype."""
    if not training:
        return x

    B, C, H, W = x.shape
    HW = H * W
    x3 = x.reshape(B, C, HW)                      # lane-dense last dim
    itemsize = jnp.dtype(x.dtype).itemsize

    T = _pick_tile_cols(HW, B * C * itemsize, max_tile_cols)
    grid = (pl.cdiv(HW, T),)

    seed_arr = jnp.asarray([seed], dtype=jnp.int32)

    kernel = functools.partial(
        _normout_kernel,
        normalization_type=normalization_type,
        use_abs=use_abs,
        hw_total=HW,
    )

    out3 = pl.pallas_call(
        kernel,
        out_shape=jax.ShapeDtypeStruct(x3.shape, x3.dtype),
        grid=grid,
        in_specs=[
            pl.BlockSpec(memory_space=pltpu.MemorySpace.SMEM),     # scalar seed
            pl.BlockSpec((B, C, T), lambda i: (0, 0, i)),          # x tile
        ],
        out_specs=pl.BlockSpec((B, C, T), lambda i: (0, 0, i)),
        compiler_params=pltpu.CompilerParams(
            dimension_semantics=("parallel",),    # shard HW tiles across TCs (v7x)
        ),
        cost_estimate=pl.CostEstimate(
            flops=8 * x.size, transcendentals=0,
            bytes_accessed=2 * x.size * itemsize),
    )(seed_arr, x3)

    return out3.reshape(B, C, H, W)


def _reference(x, seed, normalization_type, use_abs=True):
    """Plain-JAX elementwise reference using the identical hash PRNG."""
    B, C, H, W = x.shape
    HW = H * W
    x3 = x.reshape(B, C, HW)
    xf = x3.astype(jnp.float32)
    xp = jnp.abs(xf) if use_abs else xf
    m = _group_max(xp, normalization_type)
    norm_x = xp * (1.0 / m)
    lin = jnp.arange(B * C * HW, dtype=jnp.uint32).reshape(B, C, HW)
    u = _hash_uniform(lin, jnp.uint32(seed))
    return jnp.where(u < norm_x, x3, jnp.zeros_like(x3)).reshape(B, C, H, W)


if __name__ == "__main__":
    key = jax.random.PRNGKey(0)
    x = jax.random.normal(key, (2, 4, 16, 16), dtype=jnp.float32)

    for nt in ("TemporalMax", "SpatialMax", "SpatiotemporalMax"):
        out = jax.block_until_ready(
            normout(x, seed=42, normalization_type=nt, use_abs=True, training=True))
        assert out.shape == x.shape and out.dtype == x.dtype

        # NormOut invariant: each element is either kept exactly or zeroed.
        assert bool(jnp.all((out == x) | (out == 0.0))), f"invariant violated for {nt}"

        # Elementwise reference with the same hash PRNG must agree.
        ref = _reference(x, 42, nt, use_abs=True)
        match = float(jnp.mean((out == ref).astype(jnp.float32)))
        assert match > 0.999, f"reference mismatch for {nt}: {match}"

        # Both kept and dropped elements should exist (stochastic mask sanity).
        n_drop = int(jnp.sum(out == 0.0))
        assert 0 < n_drop < out.size, f"degenerate mask for {nt}"

    # Exercise the multi-tile path (grid > 1) and the per-tile RNG offsets.
    out_t = jax.block_until_ready(
        normout(x, seed=7, normalization_type="SpatialMax", max_tile_cols=128))
    ref_t = _reference(x, 7, "SpatialMax", use_abs=True)
    assert float(jnp.mean((out_t == ref_t).astype(jnp.float32))) > 0.999

    # Eval mode: identity.
    out_eval = normout(x, seed=0, training=False)
    assert bool(jnp.all(out_eval == x))

    print("KERNEL_OK")
</pallas_src>

<mosaic_0001>
module attributes {stable_mosaic.version = 11 : i64} {
  func.func @_normout_kernel(%arg0: i32, %arg1: memref<1xi32, #tpu.memory_space<smem>>, %arg2: memref<2x4x256xf32, #tpu.memory_space<vmem>>, %arg3: memref<2x4x256xf32, #tpu.memory_space<vmem>>) attributes {dimension_semantics = [#tpu.dimension_semantics<parallel>], iteration_bounds = array<i64: 1>, scalar_prefetch = 0 : i64, scratch_operands = 0 : i64, tpu.core_type = #tpu.core_type<tc>, window_params = [{transform_indices = @transform_0, window_bounds = array<i64: 1>}, {transform_indices = @transform_1, window_bounds = array<i64: 2, 4, 256>}, {transform_indices = @transform_2, window_bounds = array<i64: 2, 4, 256>}]} {
    %c0 = arith.constant 0 : index
    %c0_0 = arith.constant 0 : index
    %c0_1 = arith.constant 0 : index
    %0 = vector.load %arg2[%c0, %c0_0, %c0_1] : memref<2x4x256xf32, #tpu.memory_space<vmem>>, vector<2x4x256xf32>
    %1 = math.absf %0 : vector<2x4x256xf32>
    %cst = arith.constant dense<0xFF800000> : vector<4x256xf32>
    %2 = vector.multi_reduction <maximumf>, %1, %cst [0] : vector<2x4x256xf32> to vector<4x256xf32>
    %3 = vector.shape_cast %2 : vector<4x256xf32> to vector<1x4x256xf32>
    %cst_2 = arith.constant 1.000000e+00 : f32
    %4 = vector.broadcast %cst_2 : f32 to vector<1x4x256xf32>
    %5 = arith.divf %4, %3 : vector<1x4x256xf32>
    %6 = vector.broadcast %5 : vector<1x4x256xf32> to vector<2x4x256xf32>
    %7 = arith.mulf %1, %6 : vector<2x4x256xf32>
    %8 = tpu.iota {dimensions = array<i32: 0>} : vector<2x4x256xi32>
    %9 = tpu.iota {dimensions = array<i32: 1>} : vector<2x4x256xi32>
    %10 = tpu.iota {dimensions = array<i32: 2>} : vector<2x4x256xi32>
    %c256_i32 = arith.constant 256 : i32
    %11 = arith.muli %c256_i32, %arg0 : i32
    %12 = vector.broadcast %11 : i32 to vector<2x4x256xi32>
    %13 = arith.addi %10, %12 : vector<2x4x256xi32>
    %c4_i32 = arith.constant 4 : i32
    %14 = vector.broadcast %c4_i32 : i32 to vector<2x4x256xi32>
    %15 = arith.muli %8, %14 : vector<2x4x256xi32>
    %16 = arith.addi %15, %9 : vector<2x4x256xi32>
    %c256_i32_3 = arith.constant 256 : i32
    %17 = vector.broadcast %c256_i32_3 : i32 to vector<2x4x256xi32>
    %18 = arith.muli %16, %17 : vector<2x4x256xi32>
    %19 = arith.addi %18, %13 : vector<2x4x256xi32>
    %c0_4 = arith.constant 0 : index
    %20 = memref.load %arg1[%c0_4] : memref<1xi32, #tpu.memory_space<smem>>
    %c-1640531527_i32 = arith.constant -1640531527 : i32
    %21 = arith.muli %20, %c-1640531527_i32 : i32
    %22 = vector.broadcast %21 : i32 to vector<2x4x256xi32>
    %23 = arith.addi %19, %22 : vector<2x4x256xi32>
    %c16_i32 = arith.constant 16 : i32
    %24 = vector.broadcast %c16_i32 : i32 to vector<2x4x256xi32>
    %25 = arith.shrui %23, %24 : vector<2x4x256xi32>
    %26 = arith.xori %23, %25 : vector<2x4x256xi32>
    %c2146121005_i32 = arith.constant 2146121005 : i32
    %27 = vector.broadcast %c2146121005_i32 : i32 to vector<2x4x256xi32>
    %28 = arith.muli %26, %27 : vector<2x4x256xi32>
    %c15_i32 = arith.constant 15 : i32
    %29 = vector.broadcast %c15_i32 : i32 to vector<2x4x256xi32>
    %30 = arith.shrui %28, %29 : vector<2x4x256xi32>
    %31 = arith.xori %28, %30 : vector<2x4x256xi32>
    %c-2073254261_i32 = arith.constant -2073254261 : i32
    %32 = vector.broadcast %c-2073254261_i32 : i32 to vector<2x4x256xi32>
    %33 = arith.muli %31, %32 : vector<2x4x256xi32>
    %c16_i32_5 = arith.constant 16 : i32
    %34 = vector.broadcast %c16_i32_5 : i32 to vector<2x4x256xi32>
    %35 = arith.shrui %33, %34 : vector<2x4x256xi32>
    %36 = arith.xori %33, %35 : vector<2x4x256xi32>
    %c8_i32 = arith.constant 8 : i32
    %37 = vector.broadcast %c8_i32 : i32 to vector<2x4x256xi32>
    %38 = arith.shrui %36, %37 : vector<2x4x256xi32>
    %39 = arith.sitofp %38 : vector<2x4x256xi32> to vector<2x4x256xf32>
    %cst_6 = arith.constant 5.96046448E-8 : f32
    %40 = vector.broadcast %cst_6 : f32 to vector<2x4x256xf32>
    %41 = arith.mulf %39, %40 : vector<2x4x256xf32>
    %42 = arith.cmpf olt, %41, %7 : vector<2x4x256xf32>
    %cst_7 = arith.constant 0.000000e+00 : f32
    %43 = vector.broadcast %cst_7 : f32 to vector<2x4x256xf32>
    %44 = arith.select %42, %0, %43 : vector<2x4x256xi1>, vector<2x4x256xf32>
    %c0_8 = arith.constant 0 : index
    %c0_9 = arith.constant 0 : index
    %c0_10 = arith.constant 0 : index
    %45 = vector.load %arg3[%c0_8, %c0_9, %c0_10] : memref<2x4x256xf32, #tpu.memory_space<vmem>>, vector<2x4x256xf32>
    tpu.vector_store %arg3[%c0_8, %c0_9, %c0_10], %44 {strides = array<i32>} : memref<2x4x256xf32, #tpu.memory_space<vmem>>, vector<2x4x256xf32>,
    return
  }
  func.func @transform_0(%arg0: i32) -> i32 {
    %c0_i32 = arith.constant 0 : i32
    %c0_i32_0 = arith.constant 0 : i32
    return %c0_i32 : i32
  }
  func.func @transform_1(%arg0: i32) -> (i32, i32, i32) {
    %c0_i32 = arith.constant 0 : i32
    %c0_i32_0 = arith.constant 0 : i32
    %c0_i32_1 = arith.constant 0 : i32
    return %c0_i32, %c0_i32_0, %arg0 : i32, i32, i32
  }
  func.func @transform_2(%arg0: i32) -> (i32, i32, i32) {
    %c0_i32 = arith.constant 0 : i32
    %c0_i32_0 = arith.constant 0 : i32
    %c0_i32_1 = arith.constant 0 : i32
    return %c0_i32, %c0_i32_0, %arg0 : i32, i32, i32
  }
}

</mosaic_0001>

<bundles_post_ra>
// kernel: tpu_custom_call.1
= control target key start
LH: loop header
LB: loop body
LE: loop exit
PB: predicated region body
PF: predicated region fallthrough
CT: control target
= control target key end

     0   :  { %8 = vsyncpa [#allocation4], 0  ;;  %s270_s0 = inlined_call_operand.<no memory space> [shape: s32[1], index: 0, kind: input, shape index: {}]   ;;  %s271_s1 = inlined_call_operand.hbm [shape: f32[2,4,256], index: 1, kind: input, shape index: {}]   ;;  %s272_s2 = inlined_call_operand.hbm [shape: f32[2,4,256], index: 2, kind: output, shape index: {}]  }
   0x1   :  { %9 = vsyncpa [#allocation5], 0  ;;  %s206_s9 = smov [#allocation3]   ;;  %s158_s13 = scalar_lea.hbm %s271_s1, 256 }
   0x2   :  { %s17_s10 = sshll.u32 %s206_s9, 4  ;;  %p159_p0 = scmp.ne.s32.totalorder %s271_s1, %s158_s13  ;;  %s18_s10 = int_to_ptr.vmem [resolvable:$true] %s17_s10 }
   0x3   :  { %p162_p1 = scmp.lt.u32.totalorder %s158_s13, %s271_s1 }
   0x5   :  { %p164_p2 = pnand %p162_p1, %p159_p0 }
   0x7   :  { %167 = shalt.err (!%p164_p2)
}
   0x8   :  { %s168_s18 = scalar_lea.vmem %s18_s10, 256  ;;  %p173_p4 = scmp.lt.s32.totalorder %s18_s10, %s18_s10 }
   0x9   :  { %p169_p3 = scmp.ne.s32.totalorder %s18_s10, %s168_s18  ;;  %p174_p5 = scmp.lt.s32.totalorder %s168_s18, %s168_s18 }
   0xb   :  { %p175_p6 = por %p174_p5, %p173_p4 }
   0xd   :  { %p176_p7 = pnand %p175_p6, %p169_p3 }
   0xf   :  { %179 = shalt.err (!%p176_p7)
}
  0x10   :  { %s207_s19 = smov 128   ;;  %s208_s20 = smov 8  }
  0x11   :  { %23 = dma.hbm_to_vmem [thread:$0]  %s271_s1, 256, %s18_s10, [#allocation4], %s207_s19, %s207_s19, %s208_s20  }
  0x12   :  { %202 = dma.done.wait [#allocation4], 256  }
  0x13   :  { %203 = vsyncadd [#allocation4], 4294967040  ;;  %v36_v0 = vlaneseq  ;;  %s53_s25 = smul.u32 2654435769, %s270_s0  ;;  %v243_v10 = vld [vmem:[#allocation3] sm:$0xff]  ;;  %v245_v11 = vld [vmem:[#allocation3 + $0x8] sm:$0xff] }
  0x14   :  { %v29_v12 = vand.u32 2147483647, %v243_v10  ;;  %v30_v13 = vand.u32 2147483647, %v245_v11  ;;  %v115_v61 = vcombine.high %v243_v10, %v243_v10  ;;  %s209_s0 = smov [#allocation6]  }
  0x15   :  { %v37_v1 = vshrl.u32 %v36_v0, 7  ;;  %v39_v2 = vand.u32 127, %v36_v0  ;;  %v54_v6 = vstv %s53_s25  ;;  %s138_s1 = sshll.u32 %s209_s0, 4  ;;  %s139_s1 = int_to_ptr.vmem [resolvable:$true] %s138_s1 }
  0x16   :  { %v31_v18 = vmax.f32 %v29_v12, %v30_v13  ;;  %s180_s26 = scalar_lea.vmem %s139_s1, 256  ;;  %p185_p9 = scmp.lt.s32.totalorder %s139_s1, %s139_s1 }
  0x17   :  { %v40_v3 = vadd.s32 128, %v39_v2  ;;  %v46_v4 = vmul.u32 256, %v37_v1  ;;  %v45_v5 = vadd.s32 4, %v37_v1  ;;  %p181_p8 = scmp.ne.s32.totalorder %s139_s1, %s180_s26  ;;  %p186_p10 = scmp.lt.s32.totalorder %s180_s26, %s180_s26 }
  0x18   :  { %156 = vrcp.f32 %v31_v18 }
  0x19   :  { %v48_v7 = vadd.s32 %v46_v4, %v39_v2  ;;  %v49_v8 = vadd.s32 %v46_v4, %v40_v3  ;;  %v47_v9 = vmul.u32 256, %v45_v5  ;;  %v116_v5 = vcombine.high %v245_v11, %v245_v11  ;;  %p187_p11 = por %p186_p10, %p185_p9 }
  0x1b   :  { %v55_v14 = vadd.s32 %v54_v6, %v48_v7  ;;  %v56_v15 = vadd.s32 %v54_v6, %v49_v8  ;;  %v50_v16 = vadd.s32 %v47_v9, %v39_v2  ;;  %v51_v17 = vadd.s32 %v47_v9, %v40_v3  ;;  %p188_p12 = pnand %p187_p11, %p181_p8 }
  0x1d   :  { %v59_v19 = vshrl.u32 %v55_v14, 16  ;;  %v60_v20 = vshrl.u32 %v56_v15, 16  ;;  %v57_v21 = vadd.s32 %v54_v6, %v50_v16  ;;  %v58_v22 = vadd.s32 %v54_v6, %v51_v17 }
  0x1f   :  { %v63_v23 = vxor.u32 %v59_v19, %v55_v14  ;;  %v64_v24 = vxor.u32 %v60_v20, %v56_v15  ;;  %v61_v25 = vshrl.u32 %v57_v21, 16  ;;  %v62_v26 = vshrl.u32 %v58_v22, 16 }
  0x21   :  { %v67_v27 = vmul.u32 2146121005, %v63_v23  ;;  %v68_v28 = vmul.u32 2146121005, %v64_v24  ;;  %v65_v29 = vxor.u32 %v61_v25, %v57_v21  ;;  %v66_v30 = vxor.u32 %v62_v26, %v58_v22 }
  0x22   :  { %v157_v43 = vpop.eup %156 }
  0x23   :  { %v71_v31 = vshrl.u32 %v67_v27, 15  ;;  %v72_v32 = vshrl.u32 %v68_v28, 15  ;;  %v69_v33 = vmul.u32 2146121005, %v65_v29  ;;  %v70_v34 = vmul.u32 2146121005, %v66_v30 }
  0x24   :  { %v34_v48 = vmul.f32 %v157_v43, %v29_v12  ;;  %v35_v55 = vmul.f32 %v157_v43, %v30_v13 }
  0x25   :  { %v75_v35 = vxor.u32 %v71_v31, %v67_v27  ;;  %v76_v36 = vxor.u32 %v72_v32, %v68_v28  ;;  %v73_v37 = vshrl.u32 %v69_v33, 15  ;;  %v74_v38 = vshrl.u32 %v70_v34, 15 }
  0x26   :  { %v105_v60 = vcombine.high %v34_v48, %v34_v48  ;;  %v106_v4 = vcombine.high %v35_v55, %v35_v55 }
  0x27   :  { %v79_v39 = vmul.u32 2221713035, %v75_v35  ;;  %v80_v40 = vmul.u32 2221713035, %v76_v36  ;;  %v77_v41 = vxor.u32 %v73_v37, %v69_v33  ;;  %v78_v42 = vxor.u32 %v74_v38, %v70_v34 }
  0x29   :  { %v83_v44 = vshrl.u32 %v79_v39, 16  ;;  %v84_v45 = vshrl.u32 %v80_v40, 16  ;;  %v81_v46 = vmul.u32 2221713035, %v77_v41  ;;  %v82_v47 = vmul.u32 2221713035, %v78_v42 }
  0x2b   :  { %v87_v49 = vxor.u32 %v83_v44, %v79_v39  ;;  %v88_v50 = vxor.u32 %v84_v45, %v80_v40  ;;  %v85_v51 = vshrl.u32 %v81_v46, 16  ;;  %v86_v52 = vshrl.u32 %v82_v47, 16 }
  0x2d   :  { %v91_v53 = vshrl.u32 %v87_v49, 8  ;;  %v92_v54 = vshrl.u32 %v88_v50, 8  ;;  %v89_v56 = vxor.u32 %v85_v51, %v81_v46  ;;  %v90_v57 = vxor.u32 %v86_v52, %v82_v47 }
  0x2f   :  { %v95_v58 = vcvt.s32.f32 %v91_v53  ;;  %v96_v59 = vcvt.s32.f32 %v92_v54  ;;  %v93_v62 = vshrl.u32 %v89_v56, 8  ;;  %v94_v63 = vshrl.u32 %v90_v57, 8 }
  0x31   :  { %v99_v0 = vmul.f32 5.9604645e-08, %v95_v58  ;;  %v100_v1 = vmul.f32 5.9604645e-08, %v96_v59  ;;  %v97_v2 = vcvt.s32.f32 %v93_v62  ;;  %v98_v3 = vcvt.s32.f32 %v94_v63 }
  0x33   :  { %vm109_vm0 = vcmp.lt.f32.partialorder %v99_v0, %v34_v48  ;;  %vm110_vm1 = vcmp.lt.f32.partialorder %v100_v1, %v105_v60  ;;  %v101_v8 = vmul.f32 5.9604645e-08, %v97_v2  ;;  %v102_v9 = vmul.f32 5.9604645e-08, %v98_v3 }
  0x34   :  { %v119_v6 = vsel %vm109_vm0, %v243_v10, 0.0  ;;  %v120_v7 = vsel %vm110_vm1, %v115_v61, 0.0 }
  0x35   :  { %v127_v12 = vcombine.low %v119_v6, %v120_v7  ;;  %vm111_vm2 = vcmp.lt.f32.partialorder %v101_v8, %v35_v55  ;;  %vm112_vm3 = vcmp.lt.f32.partialorder %v102_v9, %v106_v4 }
  0x36   :  { %v121_v13 = vsel %vm111_vm2, %v245_v11, 0.0  ;;  %v122_v14 = vsel %vm112_vm3, %v116_v5, 0.0 }
  0x37   :  { %131 = vst [vmem:[#allocation6] sm:$0xff] %v127_v12  ;;  %v128_v15 = vcombine.low %v121_v13, %v122_v14 }
  0x39   :  { %132 = vst [vmem:[#allocation6 + $0x8] sm:$0xff] %v128_v15 }
  0x3a   :  { %191 = shalt.err (!%p188_p12)
}
  0x3b   :  { %s192_s29 = scalar_lea.hbm %s272_s2, 256 }
  0x3c   :  { %p193_p13 = scmp.ne.s32.totalorder %s272_s2, %s192_s29  ;;  %p196_p0 = scmp.lt.u32.totalorder %s192_s29, %s272_s2 }
  0x3e   :  { %p198_p1 = pnand %p196_p0, %p193_p13 }
  0x40   :  { %201 = shalt.err (!%p198_p1)
}
  0x41   :  { %144 = dma.vmem_to_hbm [thread:$0]  %s139_s1, 256, %s272_s2, [#allocation5], %s207_s19, %s207_s19, %s208_s20  }
  0x42   :  { %204 = dma.done.wait [#allocation5], 256  }
  0x43   :  { %205 = vsyncadd [#allocation5], 4294967040 }
  0x44   :  { %148 = vsyncpa [#allocation4], 1 }
  0x45   :  { %149 = vsyncpa [#allocation5], 1 }

</bundles_post_ra>
